<compile_context>
chip_gen: v7x
topology: tpu7x:2x2x1
jax: 0.10.0
libtpu: 0.0.40
codegen_flags: <defaults>
</compile_context>

<pallas_src>
import jax
import jax.numpy as jnp
from jax.experimental import pallas as pl
from jax.experimental.pallas import tpu as pltpu

# ----------------------------------------------------------------------------
# Flat parameter layout (float32 vector, 47 entries):
#   [ 0: 3)  w_qi (1,3)        [ 3: 4)  b_qi (1,)
#   [ 4: 7)  w_ki (1,3)        [ 7: 8)  b_ki (1,)
#   [ 8:17)  w_vi (3,3) rowmaj [17:20)  b_vi (3,)
#   [20:21)  w_qr (1,1)        [21:22)  b_qr (1,)
#   [22:23)  w_kr (1,1)        [23:24)  b_kr (1,)
#   [24:25)  w_vr (1,1)        [25:26)  b_vr (1,)
#   [26:44)  w_f  (3,6) rowmaj [44:47)  b_f  (3,)
# ----------------------------------------------------------------------------
N_PARAMS = 47
LANES = 128


def _rim_kernel(params_ref, img_ref, mask_ref, out_ref):
    f32 = jnp.float32

    # Dense (R, 128) per-channel tiles; cast to f32 in-kernel (inputs may be
    # bf16 -> halves HBM bytes on mem-bound chips, no extra XLA cast pass).
    x0 = img_ref[0, 0].astype(f32)
    x1 = img_ref[0, 1].astype(f32)
    x2 = img_ref[0, 2].astype(f32)
    m = mask_ref[0, 0].astype(f32)

    # ---- image branch (1x1 convs as scalar-weighted VPU sums) ----
    # NOTE: w_qi/b_qi already pre-scaled by 0.5 on the host.
    q_i = (params_ref[0] * x0 + params_ref[1] * x1 + params_ref[2] * x2
           + params_ref[3])
    k_i = (params_ref[4] * x0 + params_ref[5] * x1 + params_ref[6] * x2
           + params_ref[7])
    v_i = [
        (params_ref[8 + 3 * c] * x0 + params_ref[9 + 3 * c] * x1
         + params_ref[10 + 3 * c] * x2 + params_ref[17 + c])
        for c in range(3)
    ]

    # ---- mask (region prior) branch ----
    # NOTE: w_qr/b_qr already pre-scaled by 0.5 on the host.
    q_r = params_ref[20] * m + params_ref[21]
    k_r = params_ref[22] * m + params_ref[23]
    v_r = params_ref[24] * m + params_ref[25]

    # sigmoid(x) == 0.5*(tanh(0.5*x) + 1).  The 0.5*x is folded into the q
    # weights, the leading 0.5 is folded into w_f, so here only tanh + 1
    # remain.  tanh runs on the EUP (free slot vs the saturated VALU).
    a_ii = jnp.tanh(q_i * k_i) + 1.0
    a_ir = jnp.tanh(q_i * k_r) + 1.0
    a_rr = jnp.tanh(q_r * k_r) + 1.0
    a_ri = jnp.tanh(q_r * k_i) + 1.0

    air_vr = a_ir * v_r
    arr_vr = a_rr * v_r

    # Six fused channels (2*f_i[0..2], 2*f_r[0..2]) kept as separate arrays
    # (no jnp.concatenate); the missing 0.5 lives in the folded w_f.
    f = [a_ii * v_i[c] + air_vr for c in range(3)] + \
        [arr_vr + a_ri * v_i[c] for c in range(3)]

    # ---- fuse conv (3 x 6), unrolled, one store per output channel ----
    for c in range(3):
        wo = 26 + 6 * c
        acc = (params_ref[wo + 0] * f[0] + params_ref[wo + 1] * f[1]
               + params_ref[wo + 2] * f[2] + params_ref[wo + 3] * f[3]
               + params_ref[wo + 4] * f[4] + params_ref[wo + 5] * f[5]
               + params_ref[44 + c])
        out_ref[0, c] = acc.astype(out_ref.dtype)


def _fold_params(params):
    """Fold the sigmoid 0.5 constants into the conv parameters (exact)."""
    p = params.astype(jnp.float32)
    scale = jnp.ones((N_PARAMS,), jnp.float32)
    scale = scale.at[0:4].set(0.5)     # w_qi, b_qi  -> q_i pre-scaled by 0.5
    scale = scale.at[20:22].set(0.5)   # w_qr, b_qr  -> q_r pre-scaled by 0.5
    scale = scale.at[26:44].set(0.5)   # w_f (b_f unchanged) -> absorbs 0.5*(t+1)
    return p * scale


def _pick_block_rows(rows, batch, target_rows):
    """Block rows: min(rows, target), target a multiple of 8; ragged grid ok."""
    target_rows = max(8, (target_rows // 8) * 8)
    block = rows if rows <= target_rows else target_rows
    # v7x megacore: when B == 1, ensure >= 2 parallel grid steps if a legal
    # split exists (block rows must be a multiple of 8 or the full extent).
    if batch == 1 and pl.cdiv(rows, block) < 2:
        half = ((pl.cdiv(rows, 2) + 7) // 8) * 8
        if 8 <= half < rows:
            block = half
    return block


def regional_interaction(img, mask, params, *, target_rows=512):
    """img: (B,3,H,W), mask: (B,1,H,W), params: (47,) -> (B,3,H,W) f32."""
    B, Ci, H, W = img.shape
    assert Ci == 3 and mask.shape == (B, 1, H, W)
    HW = H * W

    # Lane-dense spatial layout: flatten H*W and view as (rows, 128).
    rows = pl.cdiv(HW, LANES)
    pad = rows * LANES - HW
    img_l = img.reshape(B, 3, HW)
    mask_l = mask.reshape(B, 1, HW)
    if pad:
        img_l = jnp.pad(img_l, ((0, 0), (0, 0), (0, pad)))
        mask_l = jnp.pad(mask_l, ((0, 0), (0, 0), (0, pad)))
    img_t = img_l.reshape(B, 3, rows, LANES)      # native dtype, cast in-kernel
    mask_t = mask_l.reshape(B, 1, rows, LANES)

    p = _fold_params(params)

    block_rows = _pick_block_rows(rows, B, target_rows)
    n_tiles = pl.cdiv(rows, block_rows)

    # Roofline hint for XLA's scheduler.
    cost = pl.CostEstimate(
        flops=100 * B * HW,
        transcendentals=4 * B * HW,
        bytes_accessed=(3 + 1 + 3) * 4 * B * HW,
    )

    out = pl.pallas_call(
        _rim_kernel,
        out_shape=jax.ShapeDtypeStruct((B, 3, rows, LANES), jnp.float32),
        grid_spec=pltpu.PrefetchScalarGridSpec(
            num_scalar_prefetch=1,                 # params -> SMEM, loaded once
            grid=(B, n_tiles),
            in_specs=[
                pl.BlockSpec((1, 3, block_rows, LANES),
                             lambda b, t, prm: (b, 0, t, 0)),   # img
                pl.BlockSpec((1, 1, block_rows, LANES),
                             lambda b, t, prm: (b, 0, t, 0)),   # mask
            ],
            out_specs=pl.BlockSpec((1, 3, block_rows, LANES),
                                   lambda b, t, prm: (b, 0, t, 0)),
        ),
        compiler_params=pltpu.CompilerParams(
            dimension_semantics=("parallel", "parallel"),
            vmem_limit_bytes=32 << 20),
        cost_estimate=cost,
    )(p, img_t, mask_t)

    out = out.reshape(B, 3, rows * LANES)
    if pad:
        out = out[:, :, :HW]
    return out.reshape(B, 3, H, W)


# -------------------------- parameter initialization ------------------------
def init_params(key):
    """Deterministic init mimicking torch Conv2d default (uniform +-1/sqrt(fan_in))."""
    def conv_params(k, cout, cin):
        kw, kb = jax.random.split(k)
        bound = 1.0 / jnp.sqrt(jnp.float32(cin))
        w = jax.random.uniform(kw, (cout, cin), jnp.float32, -bound, bound)
        b = jax.random.uniform(kb, (cout,), jnp.float32, -bound, bound)
        return w, b

    ks = jax.random.split(key, 7)
    w_qi, b_qi = conv_params(ks[0], 1, 3)
    w_ki, b_ki = conv_params(ks[1], 1, 3)
    w_vi, b_vi = conv_params(ks[2], 3, 3)
    w_qr, b_qr = conv_params(ks[3], 1, 1)
    w_kr, b_kr = conv_params(ks[4], 1, 1)
    w_vr, b_vr = conv_params(ks[5], 1, 1)
    w_f, b_f = conv_params(ks[6], 3, 6)

    flat = jnp.concatenate([
        w_qi.reshape(-1), b_qi,
        w_ki.reshape(-1), b_ki,
        w_vi.reshape(-1), b_vi,
        w_qr.reshape(-1), b_qr,
        w_kr.reshape(-1), b_kr,
        w_vr.reshape(-1), b_vr,
        w_f.reshape(-1), b_f,
    ])
    assert flat.shape == (N_PARAMS,)
    return flat


# --------------------------- pure-JAX reference ------------------------------
def reference(img, mask, p):
    """Unfolded f32 reference, identical to the PyTorch forward."""
    def conv(x, w, b):  # x: (B,Cin,H,W), w: (Cout,Cin), b: (Cout,)
        return jnp.einsum('oc,bchw->bohw', w, x) + b[None, :, None, None]

    w_qi, b_qi = p[0:3].reshape(1, 3), p[3:4]
    w_ki, b_ki = p[4:7].reshape(1, 3), p[7:8]
    w_vi, b_vi = p[8:17].reshape(3, 3), p[17:20]
    w_qr, b_qr = p[20:21].reshape(1, 1), p[21:22]
    w_kr, b_kr = p[22:23].reshape(1, 1), p[23:24]
    w_vr, b_vr = p[24:25].reshape(1, 1), p[25:26]
    w_f, b_f = p[26:44].reshape(3, 6), p[44:47]

    q_i = conv(img, w_qi, b_qi)
    k_i = conv(img, w_ki, b_ki)
    v_i = conv(img, w_vi, b_vi)
    q_r = conv(mask, w_qr, b_qr)
    k_r = conv(mask, w_kr, b_kr)
    v_r = conv(mask, w_vr, b_vr)

    sig = jax.nn.sigmoid
    f_i = sig(q_i * k_i) * v_i + sig(q_i * k_r) * v_r
    f_r = sig(q_r * k_r) * v_r + sig(q_r * k_i) * v_i
    return conv(jnp.concatenate([f_i, f_r], axis=1), w_f, b_f)


if __name__ == "__main__":
    key = jax.random.PRNGKey(0)
    k_img, k_mask, k_param = jax.random.split(key, 3)

    B, H, W = 2, 16, 16
    img = jax.random.normal(k_img, (B, 3, H, W), jnp.float32)
    mask = jax.random.uniform(k_mask, (B, 1, H, W), jnp.float32)
    params = init_params(k_param)

    out = regional_interaction(img, mask, params)
    out = jax.block_until_ready(out)

    ref = reference(img, mask, params)
    assert out.shape == (B, 3, H, W)
    # The tanh/0.5 folding is mathematically exact; allow ULP-level drift.
    assert jnp.allclose(out, ref, rtol=5e-5, atol=5e-5), "mismatch vs JAX reference"

    print("KERNEL_OK")
</pallas_src>

<mosaic_0001>
module attributes {stable_mosaic.version = 11 : i64} {
  func.func @_rim_kernel(%arg0: i32, %arg1: i32, %arg2: memref<47xf32, #tpu.memory_space<smem>>, %arg3: memref<1x3x2x128xf32, #tpu.memory_space<vmem>>, %arg4: memref<1x1x2x128xf32, #tpu.memory_space<vmem>>, %arg5: memref<1x3x2x128xf32, #tpu.memory_space<vmem>>) attributes {dimension_semantics = [#tpu.dimension_semantics<parallel>, #tpu.dimension_semantics<parallel>], iteration_bounds = array<i64: 2, 1>, scalar_prefetch = 1 : i64, scratch_operands = 0 : i64, tpu.core_type = #tpu.core_type<tc>, window_params = [{transform_indices = @transform_0, window_bounds = array<i64: 1, 3, 2, 128>}, {transform_indices = @transform_1, window_bounds = array<i64: 1, 1, 2, 128>}, {transform_indices = @transform_2, window_bounds = array<i64: 1, 3, 2, 128>}]} {
    %c0 = arith.constant 0 : index
    %c0_0 = arith.constant 0 : index
    %c0_1 = arith.constant 0 : index
    %c0_2 = arith.constant 0 : index
    %0 = vector.load %arg3[%c0, %c0_0, %c0_1, %c0_2] : memref<1x3x2x128xf32, #tpu.memory_space<vmem>>, vector<1x1x2x128xf32>
    %1 = vector.shape_cast %0 : vector<1x1x2x128xf32> to vector<2x128xf32>
    %c0_3 = arith.constant 0 : index
    %c1 = arith.constant 1 : index
    %c0_4 = arith.constant 0 : index
    %c0_5 = arith.constant 0 : index
    %2 = vector.load %arg3[%c0_3, %c1, %c0_4, %c0_5] : memref<1x3x2x128xf32, #tpu.memory_space<vmem>>, vector<1x1x2x128xf32>
    %3 = vector.shape_cast %2 : vector<1x1x2x128xf32> to vector<2x128xf32>
    %c0_6 = arith.constant 0 : index
    %c2 = arith.constant 2 : index
    %c0_7 = arith.constant 0 : index
    %c0_8 = arith.constant 0 : index
    %4 = vector.load %arg3[%c0_6, %c2, %c0_7, %c0_8] : memref<1x3x2x128xf32, #tpu.memory_space<vmem>>, vector<1x1x2x128xf32>
    %5 = vector.shape_cast %4 : vector<1x1x2x128xf32> to vector<2x128xf32>
    %c0_9 = arith.constant 0 : index
    %c0_10 = arith.constant 0 : index
    %c0_11 = arith.constant 0 : index
    %c0_12 = arith.constant 0 : index
    %6 = vector.load %arg4[%c0_9, %c0_10, %c0_11, %c0_12] : memref<1x1x2x128xf32, #tpu.memory_space<vmem>>, vector<1x1x2x128xf32>
    %7 = vector.shape_cast %6 : vector<1x1x2x128xf32> to vector<2x128xf32>
    %c0_13 = arith.constant 0 : index
    %8 = memref.load %arg2[%c0_13] : memref<47xf32, #tpu.memory_space<smem>>
    %9 = vector.broadcast %8 : f32 to vector<2x128xf32>
    %10 = arith.mulf %9, %1 : vector<2x128xf32>
    %c1_14 = arith.constant 1 : index
    %11 = memref.load %arg2[%c1_14] : memref<47xf32, #tpu.memory_space<smem>>
    %12 = vector.broadcast %11 : f32 to vector<2x128xf32>
    %13 = arith.mulf %12, %3 : vector<2x128xf32>
    %14 = arith.addf %10, %13 : vector<2x128xf32>
    %c2_15 = arith.constant 2 : index
    %15 = memref.load %arg2[%c2_15] : memref<47xf32, #tpu.memory_space<smem>>
    %16 = vector.broadcast %15 : f32 to vector<2x128xf32>
    %17 = arith.mulf %16, %5 : vector<2x128xf32>
    %18 = arith.addf %14, %17 : vector<2x128xf32>
    %c3 = arith.constant 3 : index
    %19 = memref.load %arg2[%c3] : memref<47xf32, #tpu.memory_space<smem>>
    %20 = vector.broadcast %19 : f32 to vector<2x128xf32>
    %21 = arith.addf %18, %20 : vector<2x128xf32>
    %c4 = arith.constant 4 : index
    %22 = memref.load %arg2[%c4] : memref<47xf32, #tpu.memory_space<smem>>
    %23 = vector.broadcast %22 : f32 to vector<2x128xf32>
    %24 = arith.mulf %23, %1 : vector<2x128xf32>
    %c5 = arith.constant 5 : index
    %25 = memref.load %arg2[%c5] : memref<47xf32, #tpu.memory_space<smem>>
    %26 = vector.broadcast %25 : f32 to vector<2x128xf32>
    %27 = arith.mulf %26, %3 : vector<2x128xf32>
    %28 = arith.addf %24, %27 : vector<2x128xf32>
    %c6 = arith.constant 6 : index
    %29 = memref.load %arg2[%c6] : memref<47xf32, #tpu.memory_space<smem>>
    %30 = vector.broadcast %29 : f32 to vector<2x128xf32>
    %31 = arith.mulf %30, %5 : vector<2x128xf32>
    %32 = arith.addf %28, %31 : vector<2x128xf32>
    %c7 = arith.constant 7 : index
    %33 = memref.load %arg2[%c7] : memref<47xf32, #tpu.memory_space<smem>>
    %34 = vector.broadcast %33 : f32 to vector<2x128xf32>
    %35 = arith.addf %32, %34 : vector<2x128xf32>
    %c8 = arith.constant 8 : index
    %36 = memref.load %arg2[%c8] : memref<47xf32, #tpu.memory_space<smem>>
    %37 = vector.broadcast %36 : f32 to vector<2x128xf32>
    %38 = arith.mulf %37, %1 : vector<2x128xf32>
    %c9 = arith.constant 9 : index
    %39 = memref.load %arg2[%c9] : memref<47xf32, #tpu.memory_space<smem>>
    %40 = vector.broadcast %39 : f32 to vector<2x128xf32>
    %41 = arith.mulf %40, %3 : vector<2x128xf32>
    %42 = arith.addf %38, %41 : vector<2x128xf32>
    %c10 = arith.constant 10 : index
    %43 = memref.load %arg2[%c10] : memref<47xf32, #tpu.memory_space<smem>>
    %44 = vector.broadcast %43 : f32 to vector<2x128xf32>
    %45 = arith.mulf %44, %5 : vector<2x128xf32>
    %46 = arith.addf %42, %45 : vector<2x128xf32>
    %c17 = arith.constant 17 : index
    %47 = memref.load %arg2[%c17] : memref<47xf32, #tpu.memory_space<smem>>
    %48 = vector.broadcast %47 : f32 to vector<2x128xf32>
    %49 = arith.addf %46, %48 : vector<2x128xf32>
    %c11 = arith.constant 11 : index
    %50 = memref.load %arg2[%c11] : memref<47xf32, #tpu.memory_space<smem>>
    %51 = vector.broadcast %50 : f32 to vector<2x128xf32>
    %52 = arith.mulf %51, %1 : vector<2x128xf32>
    %c12 = arith.constant 12 : index
    %53 = memref.load %arg2[%c12] : memref<47xf32, #tpu.memory_space<smem>>
    %54 = vector.broadcast %53 : f32 to vector<2x128xf32>
    %55 = arith.mulf %54, %3 : vector<2x128xf32>
    %56 = arith.addf %52, %55 : vector<2x128xf32>
    %c13 = arith.constant 13 : index
    %57 = memref.load %arg2[%c13] : memref<47xf32, #tpu.memory_space<smem>>
    %58 = vector.broadcast %57 : f32 to vector<2x128xf32>
    %59 = arith.mulf %58, %5 : vector<2x128xf32>
    %60 = arith.addf %56, %59 : vector<2x128xf32>
    %c18 = arith.constant 18 : index
    %61 = memref.load %arg2[%c18] : memref<47xf32, #tpu.memory_space<smem>>
    %62 = vector.broadcast %61 : f32 to vector<2x128xf32>
    %63 = arith.addf %60, %62 : vector<2x128xf32>
    %c14 = arith.constant 14 : index
    %64 = memref.load %arg2[%c14] : memref<47xf32, #tpu.memory_space<smem>>
    %65 = vector.broadcast %64 : f32 to vector<2x128xf32>
    %66 = arith.mulf %65, %1 : vector<2x128xf32>
    %c15 = arith.constant 15 : index
    %67 = memref.load %arg2[%c15] : memref<47xf32, #tpu.memory_space<smem>>
    %68 = vector.broadcast %67 : f32 to vector<2x128xf32>
    %69 = arith.mulf %68, %3 : vector<2x128xf32>
    %70 = arith.addf %66, %69 : vector<2x128xf32>
    %c16 = arith.constant 16 : index
    %71 = memref.load %arg2[%c16] : memref<47xf32, #tpu.memory_space<smem>>
    %72 = vector.broadcast %71 : f32 to vector<2x128xf32>
    %73 = arith.mulf %72, %5 : vector<2x128xf32>
    %74 = arith.addf %70, %73 : vector<2x128xf32>
    %c19 = arith.constant 19 : index
    %75 = memref.load %arg2[%c19] : memref<47xf32, #tpu.memory_space<smem>>
    %76 = vector.broadcast %75 : f32 to vector<2x128xf32>
    %77 = arith.addf %74, %76 : vector<2x128xf32>
    %c20 = arith.constant 20 : index
    %78 = memref.load %arg2[%c20] : memref<47xf32, #tpu.memory_space<smem>>
    %79 = vector.broadcast %78 : f32 to vector<2x128xf32>
    %80 = arith.mulf %79, %7 : vector<2x128xf32>
    %c21 = arith.constant 21 : index
    %81 = memref.load %arg2[%c21] : memref<47xf32, #tpu.memory_space<smem>>
    %82 = vector.broadcast %81 : f32 to vector<2x128xf32>
    %83 = arith.addf %80, %82 : vector<2x128xf32>
    %c22 = arith.constant 22 : index
    %84 = memref.load %arg2[%c22] : memref<47xf32, #tpu.memory_space<smem>>
    %85 = vector.broadcast %84 : f32 to vector<2x128xf32>
    %86 = arith.mulf %85, %7 : vector<2x128xf32>
    %c23 = arith.constant 23 : index
    %87 = memref.load %arg2[%c23] : memref<47xf32, #tpu.memory_space<smem>>
    %88 = vector.broadcast %87 : f32 to vector<2x128xf32>
    %89 = arith.addf %86, %88 : vector<2x128xf32>
    %c24 = arith.constant 24 : index
    %90 = memref.load %arg2[%c24] : memref<47xf32, #tpu.memory_space<smem>>
    %91 = vector.broadcast %90 : f32 to vector<2x128xf32>
    %92 = arith.mulf %91, %7 : vector<2x128xf32>
    %c25 = arith.constant 25 : index
    %93 = memref.load %arg2[%c25] : memref<47xf32, #tpu.memory_space<smem>>
    %94 = vector.broadcast %93 : f32 to vector<2x128xf32>
    %95 = arith.addf %92, %94 : vector<2x128xf32>
    %96 = arith.mulf %21, %35 : vector<2x128xf32>
    %97 = math.tanh %96 : vector<2x128xf32>
    %cst = arith.constant 1.000000e+00 : f32
    %98 = vector.broadcast %cst : f32 to vector<2x128xf32>
    %99 = arith.addf %97, %98 : vector<2x128xf32>
    %100 = arith.mulf %21, %89 : vector<2x128xf32>
    %101 = math.tanh %100 : vector<2x128xf32>
    %cst_16 = arith.constant 1.000000e+00 : f32
    %102 = vector.broadcast %cst_16 : f32 to vector<2x128xf32>
    %103 = arith.addf %101, %102 : vector<2x128xf32>
    %104 = arith.mulf %83, %89 : vector<2x128xf32>
    %105 = math.tanh %104 : vector<2x128xf32>
    %cst_17 = arith.constant 1.000000e+00 : f32
    %106 = vector.broadcast %cst_17 : f32 to vector<2x128xf32>
    %107 = arith.addf %105, %106 : vector<2x128xf32>
    %108 = arith.mulf %83, %35 : vector<2x128xf32>
    %109 = math.tanh %108 : vector<2x128xf32>
    %cst_18 = arith.constant 1.000000e+00 : f32
    %110 = vector.broadcast %cst_18 : f32 to vector<2x128xf32>
    %111 = arith.addf %109, %110 : vector<2x128xf32>
    %112 = arith.mulf %103, %95 : vector<2x128xf32>
    %113 = arith.mulf %107, %95 : vector<2x128xf32>
    %114 = arith.mulf %99, %49 : vector<2x128xf32>
    %115 = arith.addf %114, %112 : vector<2x128xf32>
    %116 = arith.mulf %99, %63 : vector<2x128xf32>
    %117 = arith.addf %116, %112 : vector<2x128xf32>
    %118 = arith.mulf %99, %77 : vector<2x128xf32>
    %119 = arith.addf %118, %112 : vector<2x128xf32>
    %120 = arith.mulf %111, %49 : vector<2x128xf32>
    %121 = arith.addf %113, %120 : vector<2x128xf32>
    %122 = arith.mulf %111, %63 : vector<2x128xf32>
    %123 = arith.addf %113, %122 : vector<2x128xf32>
    %124 = arith.mulf %111, %77 : vector<2x128xf32>
    %125 = arith.addf %113, %124 : vector<2x128xf32>
    %c26 = arith.constant 26 : index
    %126 = memref.load %arg2[%c26] : memref<47xf32, #tpu.memory_space<smem>>
    %127 = vector.broadcast %126 : f32 to vector<2x128xf32>
    %128 = arith.mulf %127, %115 : vector<2x128xf32>
    %c27 = arith.constant 27 : index
    %129 = memref.load %arg2[%c27] : memref<47xf32, #tpu.memory_space<smem>>
    %130 = vector.broadcast %129 : f32 to vector<2x128xf32>
    %131 = arith.mulf %130, %117 : vector<2x128xf32>
    %132 = arith.addf %128, %131 : vector<2x128xf32>
    %c28 = arith.constant 28 : index
    %133 = memref.load %arg2[%c28] : memref<47xf32, #tpu.memory_space<smem>>
    %134 = vector.broadcast %133 : f32 to vector<2x128xf32>
    %135 = arith.mulf %134, %119 : vector<2x128xf32>
    %136 = arith.addf %132, %135 : vector<2x128xf32>
    %c29 = arith.constant 29 : index
    %137 = memref.load %arg2[%c29] : memref<47xf32, #tpu.memory_space<smem>>
    %138 = vector.broadcast %137 : f32 to vector<2x128xf32>
    %139 = arith.mulf %138, %121 : vector<2x128xf32>
    %140 = arith.addf %136, %139 : vector<2x128xf32>
    %c30 = arith.constant 30 : index
    %141 = memref.load %arg2[%c30] : memref<47xf32, #tpu.memory_space<smem>>
    %142 = vector.broadcast %141 : f32 to vector<2x128xf32>
    %143 = arith.mulf %142, %123 : vector<2x128xf32>
    %144 = arith.addf %140, %143 : vector<2x128xf32>
    %c31 = arith.constant 31 : index
    %145 = memref.load %arg2[%c31] : memref<47xf32, #tpu.memory_space<smem>>
    %146 = vector.broadcast %145 : f32 to vector<2x128xf32>
    %147 = arith.mulf %146, %125 : vector<2x128xf32>
    %148 = arith.addf %144, %147 : vector<2x128xf32>
    %c44 = arith.constant 44 : index
    %149 = memref.load %arg2[%c44] : memref<47xf32, #tpu.memory_space<smem>>
    %150 = vector.broadcast %149 : f32 to vector<2x128xf32>
    %151 = arith.addf %148, %150 : vector<2x128xf32>
    %c0_19 = arith.constant 0 : index
    %c0_20 = arith.constant 0 : index
    %c0_21 = arith.constant 0 : index
    %c0_22 = arith.constant 0 : index
    %152 = vector.load %arg5[%c0_19, %c0_20, %c0_21, %c0_22] : memref<1x3x2x128xf32, #tpu.memory_space<vmem>>, vector<1x1x2x128xf32>
    %153 = vector.shape_cast %152 : vector<1x1x2x128xf32> to vector<2x128xf32>
    %154 = vector.shape_cast %151 : vector<2x128xf32> to vector<1x1x2x128xf32>
    tpu.vector_store %arg5[%c0_19, %c0_20, %c0_21, %c0_22], %154 {strides = array<i32>} : memref<1x3x2x128xf32, #tpu.memory_space<vmem>>, vector<1x1x2x128xf32>,
    %c32 = arith.constant 32 : index
    %155 = memref.load %arg2[%c32] : memref<47xf32, #tpu.memory_space<smem>>
    %156 = vector.broadcast %155 : f32 to vector<2x128xf32>
    %157 = arith.mulf %156, %115 : vector<2x128xf32>
    %c33 = arith.constant 33 : index
    %158 = memref.load %arg2[%c33] : memref<47xf32, #tpu.memory_space<smem>>
    %159 = vector.broadcast %158 : f32 to vector<2x128xf32>
    %160 = arith.mulf %159, %117 : vector<2x128xf32>
    %161 = arith.addf %157, %160 : vector<2x128xf32>
    %c34 = arith.constant 34 : index
    %162 = memref.load %arg2[%c34] : memref<47xf32, #tpu.memory_space<smem>>
    %163 = vector.broadcast %162 : f32 to vector<2x128xf32>
    %164 = arith.mulf %163, %119 : vector<2x128xf32>
    %165 = arith.addf %161, %164 : vector<2x128xf32>
    %c35 = arith.constant 35 : index
    %166 = memref.load %arg2[%c35] : memref<47xf32, #tpu.memory_space<smem>>
    %167 = vector.broadcast %166 : f32 to vector<2x128xf32>
    %168 = arith.mulf %167, %121 : vector<2x128xf32>
    %169 = arith.addf %165, %168 : vector<2x128xf32>
    %c36 = arith.constant 36 : index
    %170 = memref.load %arg2[%c36] : memref<47xf32, #tpu.memory_space<smem>>
    %171 = vector.broadcast %170 : f32 to vector<2x128xf32>
    %172 = arith.mulf %171, %123 : vector<2x128xf32>
    %173 = arith.addf %169, %172 : vector<2x128xf32>
    %c37 = arith.constant 37 : index
    %174 = memref.load %arg2[%c37] : memref<47xf32, #tpu.memory_space<smem>>
    %175 = vector.broadcast %174 : f32 to vector<2x128xf32>
    %176 = arith.mulf %175, %125 : vector<2x128xf32>
    %177 = arith.addf %173, %176 : vector<2x128xf32>
    %c45 = arith.constant 45 : index
    %178 = memref.load %arg2[%c45] : memref<47xf32, #tpu.memory_space<smem>>
    %179 = vector.broadcast %178 : f32 to vector<2x128xf32>
    %180 = arith.addf %177, %179 : vector<2x128xf32>
    %c0_23 = arith.constant 0 : index
    %c1_24 = arith.constant 1 : index
    %c0_25 = arith.constant 0 : index
    %c0_26 = arith.constant 0 : index
    %181 = vector.load %arg5[%c0_23, %c1_24, %c0_25, %c0_26] : memref<1x3x2x128xf32, #tpu.memory_space<vmem>>, vector<1x1x2x128xf32>
    %182 = vector.shape_cast %181 : vector<1x1x2x128xf32> to vector<2x128xf32>
    %183 = vector.shape_cast %180 : vector<2x128xf32> to vector<1x1x2x128xf32>
    tpu.vector_store %arg5[%c0_23, %c1_24, %c0_25, %c0_26], %183 {strides = array<i32>} : memref<1x3x2x128xf32, #tpu.memory_space<vmem>>, vector<1x1x2x128xf32>,
    %c38 = arith.constant 38 : index
    %184 = memref.load %arg2[%c38] : memref<47xf32, #tpu.memory_space<smem>>
    %185 = vector.broadcast %184 : f32 to vector<2x128xf32>
    %186 = arith.mulf %185, %115 : vector<2x128xf32>
    %c39 = arith.constant 39 : index
    %187 = memref.load %arg2[%c39] : memref<47xf32, #tpu.memory_space<smem>>
    %188 = vector.broadcast %187 : f32 to vector<2x128xf32>
    %189 = arith.mulf %188, %117 : vector<2x128xf32>
    %190 = arith.addf %186, %189 : vector<2x128xf32>
    %c40 = arith.constant 40 : index
    %191 = memref.load %arg2[%c40] : memref<47xf32, #tpu.memory_space<smem>>
    %192 = vector.broadcast %191 : f32 to vector<2x128xf32>
    %193 = arith.mulf %192, %119 : vector<2x128xf32>
    %194 = arith.addf %190, %193 : vector<2x128xf32>
    %c41 = arith.constant 41 : index
    %195 = memref.load %arg2[%c41] : memref<47xf32, #tpu.memory_space<smem>>
    %196 = vector.broadcast %195 : f32 to vector<2x128xf32>
    %197 = arith.mulf %196, %121 : vector<2x128xf32>
    %198 = arith.addf %194, %197 : vector<2x128xf32>
    %c42 = arith.constant 42 : index
    %199 = memref.load %arg2[%c42] : memref<47xf32, #tpu.memory_space<smem>>
    %200 = vector.broadcast %199 : f32 to vector<2x128xf32>
    %201 = arith.mulf %200, %123 : vector<2x128xf32>
    %202 = arith.addf %198, %201 : vector<2x128xf32>
    %c43 = arith.constant 43 : index
    %203 = memref.load %arg2[%c43] : memref<47xf32, #tpu.memory_space<smem>>
    %204 = vector.broadcast %203 : f32 to vector<2x128xf32>
    %205 = arith.mulf %204, %125 : vector<2x128xf32>
    %206 = arith.addf %202, %205 : vector<2x128xf32>
    %c46 = arith.constant 46 : index
    %207 = memref.load %arg2[%c46] : memref<47xf32, #tpu.memory_space<smem>>
    %208 = vector.broadcast %207 : f32 to vector<2x128xf32>
    %209 = arith.addf %206, %208 : vector<2x128xf32>
    %c0_27 = arith.constant 0 : index
    %c2_28 = arith.constant 2 : index
    %c0_29 = arith.constant 0 : index
    %c0_30 = arith.constant 0 : index
    %210 = vector.load %arg5[%c0_27, %c2_28, %c0_29, %c0_30] : memref<1x3x2x128xf32, #tpu.memory_space<vmem>>, vector<1x1x2x128xf32>
    %211 = vector.shape_cast %210 : vector<1x1x2x128xf32> to vector<2x128xf32>
    %212 = vector.shape_cast %209 : vector<2x128xf32> to vector<1x1x2x128xf32>
    tpu.vector_store %arg5[%c0_27, %c2_28, %c0_29, %c0_30], %212 {strides = array<i32>} : memref<1x3x2x128xf32, #tpu.memory_space<vmem>>, vector<1x1x2x128xf32>,
    return
  }
  func.func @transform_0(%arg0: i32, %arg1: i32, %arg2: memref<47xf32, #tpu.memory_space<smem>>) -> (i32, i32, i32, i32) {
    %c0_i32 = arith.constant 0 : i32
    %c0_i32_0 = arith.constant 0 : i32
    %c0_i32_1 = arith.constant 0 : i32
    return %arg0, %c0_i32, %arg1, %c0_i32_0 : i32, i32, i32, i32
  }
  func.func @transform_1(%arg0: i32, %arg1: i32, %arg2: memref<47xf32, #tpu.memory_space<smem>>) -> (i32, i32, i32, i32) {
    %c0_i32 = arith.constant 0 : i32
    %c0_i32_0 = arith.constant 0 : i32
    %c0_i32_1 = arith.constant 0 : i32
    return %arg0, %c0_i32, %arg1, %c0_i32_0 : i32, i32, i32, i32
  }
  func.func @transform_2(%arg0: i32, %arg1: i32, %arg2: memref<47xf32, #tpu.memory_space<smem>>) -> (i32, i32, i32, i32) {
    %c0_i32 = arith.constant 0 : i32
    %c0_i32_0 = arith.constant 0 : i32
    %c0_i32_1 = arith.constant 0 : i32
    return %arg0, %c0_i32, %arg1, %c0_i32_0 : i32, i32, i32, i32
  }
}

</mosaic_0001>

<bundles_post_ra>
// kernel: tpu_custom_call.1
= control target key start
LH: loop header
LB: loop body
LE: loop exit
PB: predicated region body
PF: predicated region fallthrough
CT: control target
= control target key end

     0   :  { %s1145_s0 = inlined_call_operand.hbm [shape: f32[47], index: 0, kind: input, shape index: {}]   ;;  %s1146_s1 = inlined_call_operand.hbm [shape: f32[2,3,2,128], index: 1, kind: input, shape index: {}]   ;;  %s1147_s2 = inlined_call_operand.vmem [shape: f32[2,1,2,128], index: 2, kind: input, shape index: {}]   ;;  %s1148_s3 = inlined_call_operand.hbm [shape: f32[2,3,2,128], index: 3, kind: output, shape index: {}]  }
   0x1   :  { %1152 = sst [smem:[#allocation12_spill]] %s1146_s1  ;;  %s669_s14 = scalar_lea.hbm %s1145_s0, 16 }
   0x2   :  { %p670_p0 = scmp.ne.s32.totalorder %s1145_s0, %s669_s14  ;;  %p673_p1 = scmp.lt.u32.totalorder %s669_s14, %s1145_s0 }
   0x4   :  { %p675_p2 = pnand %p673_p1, %p670_p0 }
   0x6   :  { %678 = shalt.err (!%p675_p2)  }
   0x7   :  { %s795_s19 = smov [#allocation3]  }
   0x8   :  { %9 = dma.hbm_to_smem %s1145_s0, 16, %s795_s19, [#allocation2] }
   0x9   :  { %761 = dma.done.wait [#allocation2], 16 }
   0xa   :  { %762 = vsyncadd [#allocation2], 4294967280 }
   0xb   :  { %11 = sfence }
   0xc   :  { %12 = vsyncpa [#allocation5], 0 }
   0xd   :  { %14 = vsyncpa [#allocation5 + $0x1], 0 }
   0xe   :  { %15 = vsyncpa [#allocation6], 0 }
   0xf   :  { %17 = vsyncpa [#allocation6 + $0x1], 0  ;;  %s834_s22 = smov 0   ;;  %s836_s23 = smov 0  }
  0x10   :  { %s838_s24 = smov 0   ;;  %s840_s25 = smov 0  }
  0x11   :  { %s842_s26 = smov 0   ;;  %s844_s27 = smov 0  }
  0x12 LB: > { %s530_s0 = sadd.s32 4294967295, %s793_s27   ;;  %s531_s28 = sadd.s32 4294967294, %s793_s27   ;;  %s793_s27 = sphi %s844_s27, %s23_s27   ;;  %s789_s26 = sphi %s842_s26, %s1170_s26   ;;  %s785_s25 = sphi %s840_s25, %s1169_s25   ;;  %s781_s24 = sphi %s838_s24, %s1168_s24   ;;  %s777_s23 = sphi %s836_s23, %s1167_s23   ;;  %s773_s22 = sphi %s834_s22, %s1166_s22  }
  0x13   : > { %s35_s29 = sadd.s32 1, %s789_s26  ;;  %s44_s30 = sadd.s32 1, %s781_s24 }
  0x14   : > { %p37_p3 = scmp.ge.s32.totalorder %s35_s29, 2  ;;  %p51_p4 = scmp.ne.s32.totalorder %s781_s24, %s777_s23 }
  0x15   : > { %p52_p5 = scmp.eq.s32.totalorder %s793_s27, 0  ;;  %p57_p6 = scmp.ne.s32.totalorder %s777_s23, %s773_s22 }
  0x16   : > { %s1172_s29 = smov (%p37_p3, %s35_s29), 0  ;;  %p58_p8 = scmp.eq.s32.totalorder %s530_s0, 0 }
  0x17   : > { %1153 = sst [smem:[#allocation11_spill]] %s1172_s29  ;;  %p875_p7 = por %p52_p5, %p51_p4 }
  0x18   : > { %s39_s5 = ssub.s32 %s789_s26, %s1172_s29  ;;  %p111_p9 = scmp.eq.s32.totalorder %s530_s0, 1 }
  0x19   : > { %p42_p10 = scmp.eq.s32.totalorder %s39_s5, 0  ;;  %p881_p11 = por %p58_p8, %p57_p6 }
  0x1a   : > { %p885_p12 = por %p111_p9, %p51_p4  ;;  %p117_p13 = scmp.eq.s32.totalorder %s531_s28, 1 }
  0x1b   : > { %s890_s8 = scalar_select %p42_p10, %s781_s24, %s44_s30  }
  0x1c   : > { %s1156_s7 = scalar_select %p885_p12, 1, 0 }
  0x1d   : > { %p892_p0 = por %p117_p13, %p57_p6  ;;  %p606_p2 = scmp.lt.s32.totalorder %s793_s27, 2 }
  0x1e   : > { %s137_s10 = sand.u32 1, %s781_s24   ;;  %s591_s12 = smul.u32 96, %s789_s26 }
  0x1f   : > { %s1157_s9 = scalar_select %p892_p0, 1, 0 }
  0x20   : > { %s590_s11 = smul.u32 6, %s137_s10  ;;  %p902_p3 = pnand %p606_p2, %p875_p7 }
  0x21   : > { %s1159_s1 = sld [smem:[#allocation12_spill]]  ;;  %s914_s19 = scalar_lea.sflag [#allocation5], %s137_s10 }
  0x22   : > { %s141_s17 = scalar_lea.vmem [#allocation4], %s590_s11  ;;  %p681_p6 = pneg %p902_p3 }
  0x23   : > { %s149_s18 = sshll.u32 %s141_s17, 4  ;;  %s911_s18 = int_to_ptr.vmem [resolvable:$true] %s149_s18 }
  0x27   : > { %s909_s16 = scalar_lea.hbm %s1159_s1, %s591_s12  ;;  %s684_s28 = scalar_lea.hbm %s1159_s1, 192 }
  0x28   : > { %s679_s20 = scalar_lea.hbm %s909_s16, 96  ;;  %p685_p9 = scmp.lt.u32.totalorder %s909_s16, %s1159_s1 }
  0x29   : > { %p680_p5 = scmp.ne.s32.totalorder %s909_s16, %s679_s20  ;;  %p686_p10 = scmp.lt.u32.totalorder %s684_s28, %s679_s20 }
  0x2a   : > { %p688_p2 = scmp.lt.u32.totalorder %s679_s20, %s909_s16 }
  0x2b   : > { %p682_p7 = pnand %p681_p6, %p680_p5  ;;  %p687_p13 = por %p686_p10, %p685_p9 }
  0x2d   : > { %p683_p8 = pneg %p682_p7  ;;  %p689_p1 = por %p688_p2, %p687_p13 }
  0x2f   : > { %p690_p4 = pnand %p689_p1, %p683_p8 }
  0x31   : > { %693 = shalt.err (!%p690_p4)
}
  0x32   : > { %s694_s5 = scalar_lea.vmem %s911_s18, 96  ;;  %s796_s10 = smov [#allocation4]  }
  0x33   : > { %p695_p5 = scmp.ne.s32.totalorder %s911_s18, %s694_s5  ;;  %s699_s11 = sshll.u32 %s796_s10, 4  ;;  %s700_s11 = int_to_ptr.vmem [resolvable:$false] %s699_s11 }
  0x34   : > { %s701_s12 = scalar_lea.vmem %s700_s11, 192  ;;  %p702_p12 = scmp.lt.s32.totalorder %s911_s18, %s700_s11 }
  0x35   : > { %p697_p7 = pnand %p695_p5, %p681_p6  ;;  %p703_p9 = scmp.lt.s32.totalorder %s701_s12, %s694_s5 }
  0x37   : > { %p698_p0 = pneg %p697_p7  ;;  %p704_p10 = por %p703_p9, %p702_p12 }
  0x39   : > { %p705_p13 = pnand %p704_p10, %p698_p0 }
  0x3b   : > { %708 = shalt.err (!%p705_p13)
}
  0x3c   : > { %s797_s14 = smov 32   ;;  %s798_s15 = smov 2  }
  0x3d   : > { %601 = dma.hbm_to_vmem [thread:$0]  (!%p902_p3), %s909_s16, 96, %s911_s18, %s914_s19, %s797_s14, %s797_s14, %s798_s15  }
  0x3e   : > { %p167_p1 = scmp.lt.s32.totalorder %s793_s27, 3  ;;  %p1160_p4 = scmp.ge.s32.totalorder %s793_s27, 1 }
  0x40   : > { %p168_p6 = pnand %p1160_p4, %p167_p1 }
  0x41   : > { %s946_s17 = sand.u32 (!%p168_p6), 1, %s777_s23  }
  0x42   : > { %171 = sbr.rel (%p168_p6) target bundleno = 146 (0x92), region = 28  ;;  %s174_s21 = scalar_lea.sflag (!%p168_p6), [#allocation5], %s946_s17 }
  0x43   : > { %s1150_s20 = smul.u32 (!%p168_p6), 6, %s946_s17 }
  0x45   : > { %s177_s0 = scalar_lea.vmem (!%p168_p6), [#allocation4], %s1150_s20 }
  0x49   : > { %764 = dma.done.wait (%p881_p11), %s174_s21, 96  }
  0x4a   : > { %766 = vsyncadd (%p881_p11), %s174_s21, 4294967200  ;;  %p205_p12 = scmp.lt.s32.totalorder %s785_s25, 1  ;;  %s218_s13 = sld [smem:[#allocation3]]  ;;  %v212_v0 = vld [vmem:[%s177_s0] sm:$0x3] }
  0x4b   : > { %s539_s16 = sld [smem:[#allocation3 + $0x1]]  ;;  %s540_s19 = sld [smem:[#allocation3 + $0x2]]  ;;  %v537_v1 = vld [vmem:[%s177_s0 + $0x2] sm:$0x3]  ;;  %v960_v3 = vld [vmem:[%s177_s0 + $0x4] sm:$0x3] }
  0x4c   : > { %s958_s18 = scalar_select %p205_p12, %s785_s25, 1 }
  0x4d   : > { %s542_s28 = sld [smem:[#allocation3 + $0x4]]  ;;  %s543_s30 = sld [smem:[#allocation3 + $0x5]] }
  0x4e   : > { %s544_s4 = sld [smem:[#allocation3 + $0x6]]  ;;  %s962_s6 = sld [smem:[#allocation3 + $0x3]] }
  0x4f   : > { %s964_s5 = sld [smem:[#allocation3 + $0x7]]  ;;  %s966_s10 = sld [smem:[#allocation3 + $0x8]] }
  0x50   : > { %v219_v2 = vstv %s218_s13  ;;  %s536_s11 = sshll.u32 %s958_s18, 1  ;;  %s969_s12 = sld [smem:[#allocation3 + $0x9]] }
  0x51   : > { %v220_v4 = vmul.f32 %v219_v2, %v212_v0  ;;  %v222_v5 = vstv %s539_s16  ;;  %v226_v7 = vstv %s540_s19  ;;  %s972_s14 = sld [smem:[#allocation3 + $0xa]]  ;;  %s974_s15 = sld [smem:[#allocation3 + $0xb]] }
  0x52   : > { %v223_v6 = vmul.f32 %v537_v1, %v222_v5  ;;  %v227_v10 = vmul.f32 %v960_v3, %v226_v7  ;;  %s976_s21 = sld [smem:[#allocation3 + $0xc]]  ;;  %s978_s0 = sld [smem:[#allocation3 + $0xd]] }
  0x53   : > { %v233_v8 = vstv %s542_s28  ;;  %v236_v12 = vstv %s543_s30  ;;  %s981_s13 = sld [smem:[#allocation3 + $0xe]]  ;;  %s983_s16 = sld [smem:[#allocation3 + $0xf]] }
  0x54   : > { %v224_v9 = vadd.f32 %v223_v6, %v220_v4  ;;  %v234_v11 = vmul.f32 %v233_v8, %v212_v0  ;;  %v237_v13 = vmul.f32 %v537_v1, %v236_v12  ;;  %v240_v14 = vstv %s544_s4  ;;  %s558_s18 = sld [smem:[#allocation3 + $0x14]]  ;;  %s985_s19 = sld [smem:[#allocation3 + $0x15]] }
  0x55   : > { %v241_v15 = vmul.f32 %v960_v3, %v240_v14  ;;  %s560_s28 = sld [smem:[#allocation3 + $0x16]]  ;;  %s987_s30 = sld [smem:[#allocation3 + $0x17]]  ;;  %v230_v18 = vstv %s962_s6  ;;  %v244_v20 = vstv %s964_s5  ;;  %v247_v21 = vstv %s966_s10 }
  0x56   : > { %v238_v16 = vadd.f32 %v237_v13, %v234_v11  ;;  %v228_v17 = vadd.f32 %v227_v10, %v224_v9  ;;  %s211_s1 = scalar_lea.vmem %s1147_s2, %s536_s11  ;;  %s995_s29 = sld [smem:[#allocation3 + $0x10]]  ;;  %v250_v23 = vstv %s969_s12  ;;  %v248_v26 = vmul.f32 %v247_v21, %v212_v0 }
  0x57   : > { %v217_v24 = vld [vmem:[%s211_s1] sm:$0x3]  ;;  %v261_v27 = vstv %s974_s15  ;;  %v251_v33 = vmul.f32 %v537_v1, %v250_v23  ;;  %v254_v34 = vstv %s972_s14  ;;  %s1006_s20 = sld [smem:[#allocation3 + $0x18]]  ;;  %s1008_s1 = sld [smem:[#allocation3 + $0x11]] }
  0x58   : > { %v242_v19 = vadd.f32 %v241_v15, %v238_v16  ;;  %v231_v22 = vadd.f32 %v230_v18, %v228_v17  ;;  %v264_v28 = vstv %s976_s21  ;;  %v262_v37 = vmul.f32 %v261_v27, %v212_v0  ;;  %s1010_s6 = sld [smem:[#allocation3 + $0x12]]  ;;  %s1013_s5 = sld [smem:[#allocation3 + $0x13]] }
  0x59   : > { %v275_v29 = vstv %s981_s13  ;;  %v278_v30 = vstv %s983_s16  ;;  %v268_v38 = vstv %s978_s0  ;;  %v265_v41 = vmul.f32 %v537_v1, %v264_v28  ;;  %s1017_s10 = sld [smem:[#allocation3 + $0x19]]  ;;  %s1022_s11 = sld [smem:[#allocation3 + $0x1b]] }
  0x5a   : > { %v245_v25 = vadd.f32 %v244_v20, %v242_v19  ;;  %v289_v31 = vstv %s558_s18  ;;  %v292_v32 = vstv %s985_s19  ;;  %v276_v42 = vmul.f32 %v275_v29, %v212_v0  ;;  %s1025_s12 = sld [smem:[#allocation3 + $0x1c]]  ;;  %s1027_s14 = sld [smem:[#allocation3 + $0x1d]] }
  0x5b   : > { %v290_v35 = vmul.f32 %v289_v31, %v217_v24  ;;  %v295_v36 = vstv %s560_s28  ;;  %v298_v40 = vstv %s987_s30  ;;  %v279_v43 = vmul.f32 %v537_v1, %v278_v30  ;;  %s1029_s15 = sld [smem:[#allocation3 + $0x1e]]  ;;  %s1034_s21 = sld [smem:[#allocation3 + $0x1f]] }
  0x5c   : > { %v296_v39 = vmul.f32 %v295_v36, %v217_v24  ;;  %v282_v45 = vstv %s995_s29  ;;  %v306_v47 = vmul.f32 %v245_v25, %v231_v22  ;;  %v252_v48 = vadd.f32 %v251_v33, %v248_v26  ;;  %s1020_s29 = sld [smem:[#allocation3 + $0x1a]]  ;;  %s1036_s0 = sld [smem:[#allocation3 + $0x20]] }
  0x5d   : > { %v293_v44 = vadd.f32 %v292_v32, %v290_v35  ;;  %v255_v49 = vmul.f32 %v960_v3, %v254_v34  ;;  %v269_v51 = vmul.f32 %v960_v3, %v268_v38  ;;  %v266_v54 = vadd.f32 %v265_v41, %v262_v37  ;;  %s1038_s13 = sld [smem:[#allocation3 + $0x21]]  ;;  %s1040_s16 = sld [smem:[#allocation3 + $0x22]] }
  0x5e   : > { %v299_v46 = vadd.f32 %v298_v40, %v296_v39  ;;  %661 = vtanh.f32 %v306_v47  ;;  %v280_v55 = vadd.f32 %v279_v43, %v276_v42  ;;  %v283_v56 = vmul.f32 %v960_v3, %v282_v45  ;;  %s1043_s18 = sld [smem:[#allocation3 + $0x23]]  ;;  %s1045_s19 = sld [smem:[#allocation3 + $0x24]] }
  0x5f   : > { %v315_v50 = vmul.f32 %v293_v44, %v245_v25  ;;  %v301_v57 = vstv %s1006_s20  ;;  %v256_v58 = vadd.f32 %v255_v49, %v252_v48  ;;  %v270_v59 = vadd.f32 %v269_v51, %v266_v54  ;;  %s1047_s28 = sld [smem:[#allocation3 + $0x26]]  ;;  %s1049_s30 = sld [smem:[#allocation3 + $0x27]] }
  0x60   : > { %v309_v52 = vmul.f32 %v299_v46, %v231_v22  ;;  %v312_v53 = vmul.f32 %v299_v46, %v293_v44  ;;  %v284_v60 = vadd.f32 %v283_v56, %v280_v55  ;;  %v258_v61 = vstv %s1008_s1  ;;  %s1052_s4 = sld [smem:[#allocation3 + $0x25]]  ;;  %s1057_s20 = sld [smem:[#allocation3 + $0x28]] }
  0x61   : > { %663 = vtanh.f32 %v315_v50  ;;  %v272_v62 = vstv %s1010_s6  ;;  %v286_v63 = vstv %s1013_s5  ;;  %v302_v0 = vmul.f32 %v301_v57, %v217_v24  ;;  %s1059_s1 = sld [smem:[#allocation3 + $0x29]]  ;;  %s1065_s6 = sld [smem:[#allocation3 + $0x2a]] }
  0x62   : > { %665 = vtanh.f32 %v309_v52  ;;  %v304_v1 = vstv %s1017_s10  ;;  %v259_v2 = vadd.f32 %v258_v61, %v256_v58  ;;  %v273_v3 = vadd.f32 %v272_v62, %v270_v59  ;;  %s1070_s5 = sld [smem:[#allocation3 + $0x2b]]  ;;  %s1074_s10 = sld [smem:[#allocation3 + $0x2c]] }
  0x63   : > { %667 = vtanh.f32 %v312_v53  ;;  %v287_v4 = vadd.f32 %v286_v63, %v284_v60  ;;  %v305_v7 = vadd.f32 %v304_v1, %v302_v0  ;;  %v333_v9 = vstv %s1020_s29  ;;  %s1079_s29 = sld [smem:[#allocation3 + $0x2d]]  ;;  %p1162_p0 = scmp.ne.s32.totalorder %s1156_s7, 0 }
  0x64   : > { %v336_v12 = vstv %s1022_s11  ;;  %v340_v13 = vstv %s1025_s12  ;;  %v344_v14 = vstv %s1027_s14  ;;  %v348_v23 = vstv %s1029_s15  ;;  %s1082_s11 = sld [smem:[#allocation3 + $0x2e]]  ;;  %s1161_s12 = smul.u32 6, %s946_s17 }
  0x65   : > { %v352_v25 = vstv %s1034_s21  ;;  %v360_v26 = vstv %s1036_s0  ;;  %v363_v27 = vstv %s1038_s13  ;;  %v367_v29 = vstv %s1040_s16  ;;  %s593_s21 = smul.u32 96, %s785_s25 }
  0x66   : > { %v371_v30 = vstv %s1043_s18  ;;  %v375_v31 = vstv %s1045_s19  ;;  %v388_v38 = vstv %s1047_s28  ;;  %v391_v39 = vstv %s1049_s30  ;;  %s204_s14 = scalar_lea.vmem [#allocation7], %s1161_s12  ;;  %s416_s18 = scalar_lea.sflag [#allocation6], %s946_s17 }
  0x67   : > { %v379_v45 = vstv %s1052_s4  ;;  %v395_v46 = vstv %s1057_s20  ;;  %v399_v47 = vstv %s1059_s1  ;;  %v403_v59 = vstv %s1065_s6  ;;  %s430_s15 = sshll.u32 %s204_s14, 4  ;;  %s1096_s16 = scalar_lea.hbm %s1148_s3, %s593_s21  ;;  %s1091_s15 = int_to_ptr.vmem [resolvable:$true] %s430_s15 }
  0x68   : > { %v662_v5 = vpop.eup %661  ;;  %s709_s25 = scalar_lea.vmem %s1091_s15, 96  ;;  %s799_s19 = smov [#allocation7]  }
  0x69   : > { %v308_v8 = vadd.f32 1.0, %v662_v5  ;;  %p710_p11 = scmp.ne.s32.totalorder %s1091_s15, %s709_s25  ;;  %s713_s28 = sshll.u32 %s799_s19, 4  ;;  %s714_s28 = int_to_ptr.vmem [resolvable:$false] %s713_s28 }
  0x6a   : > { %s715_s30 = scalar_lea.vmem %s714_s28, 192  ;;  %p716_p2 = scmp.lt.s32.totalorder %s1091_s15, %s714_s28 }
  0x6b   : > { %v664_v6 = vpop.eup %663  ;;  %v320_v17 = vmul.f32 %v308_v8, %v259_v2  ;;  %v322_v18 = vmul.f32 %v308_v8, %v273_v3  ;;  %v324_v19 = vmul.f32 %v308_v8, %v287_v4  ;;  %v356_v8 = vstv %s1074_s10  ;;  %p711_p3 = pnand %p710_p11, %p1162_p0  ;;  %p717_p5 = scmp.lt.s32.totalorder %s715_s30, %s709_s25 }
  0x6c   : > { %v666_v10 = vpop.eup %665  ;;  %v317_v11 = vadd.f32 1.0, %v664_v6 }
  0x6d   : > { %v668_v15 = vpop.eup %667  ;;  %v311_v16 = vadd.f32 1.0, %v666_v10  ;;  %p712_p8 = pneg %p711_p3  ;;  %p718_p7 = por %p717_p5, %p716_p2 }
  0x6e   : > { %v314_v20 = vadd.f32 1.0, %v668_v15  ;;  %v326_v21 = vmul.f32 %v317_v11, %v259_v2  ;;  %v328_v22 = vmul.f32 %v317_v11, %v273_v3  ;;  %v330_v35 = vmul.f32 %v317_v11, %v287_v4 }
  0x6f   : > { %v318_v24 = vmul.f32 %v311_v16, %v305_v7  ;;  %v407_v2 = vstv %s1070_s5  ;;  %p719_p9 = pnand %p718_p7, %p712_p8 }
  0x70   : > { %v319_v28 = vmul.f32 %v314_v20, %v305_v7 }
  0x71   : > { %v321_v32 = vadd.f32 %v320_v17, %v318_v24  ;;  %v323_v33 = vadd.f32 %v322_v18, %v318_v24  ;;  %v325_v34 = vadd.f32 %v324_v19, %v318_v24  ;;  %v411_v17 = vstv %s1082_s11 }
  0x72   : > { %v327_v36 = vadd.f32 %v326_v21, %v319_v28  ;;  %v329_v37 = vadd.f32 %v328_v22, %v319_v28  ;;  %v331_v48 = vadd.f32 %v330_v35, %v319_v28 }
  0x73   : > { %v334_v40 = vmul.f32 %v333_v9, %v321_v32  ;;  %v337_v41 = vmul.f32 %v336_v12, %v323_v33  ;;  %v341_v42 = vmul.f32 %v340_v13, %v325_v34  ;;  %v361_v43 = vmul.f32 %v360_v26, %v321_v32 }
  0x74   : > { %v364_v44 = vmul.f32 %v363_v27, %v323_v33  ;;  %v345_v50 = vmul.f32 %v344_v14, %v327_v36  ;;  %v368_v51 = vmul.f32 %v367_v29, %v325_v34  ;;  %v372_v53 = vmul.f32 %v371_v30, %v327_v36 }
  0x75   : > { %v338_v49 = vadd.f32 %v337_v41, %v334_v40  ;;  %v389_v54 = vmul.f32 %v388_v38, %v321_v32  ;;  %v392_v55 = vmul.f32 %v391_v39, %v323_v33  ;;  %v349_v57 = vmul.f32 %v348_v23, %v329_v37 }
  0x76   : > { %v365_v52 = vadd.f32 %v364_v44, %v361_v43  ;;  %v396_v58 = vmul.f32 %v395_v46, %v325_v34  ;;  %v376_v61 = vmul.f32 %v375_v31, %v329_v37  ;;  %v400_v63 = vmul.f32 %v399_v47, %v327_v36 }
  0x77   : > { %v342_v56 = vadd.f32 %v341_v42, %v338_v49  ;;  %v393_v62 = vadd.f32 %v392_v55, %v389_v54  ;;  %v353_v1 = vmul.f32 %v352_v25, %v331_v48  ;;  %v380_v4 = vmul.f32 %v379_v45, %v331_v48 }
  0x78   : > { %v369_v60 = vadd.f32 %v368_v51, %v365_v52  ;;  %v404_v6 = vmul.f32 %v403_v59, %v329_v37  ;;  %v408_v11 = vmul.f32 %v407_v2, %v331_v48  ;;  %v383_v13 = vstv %s1079_s29 }
  0x79   : > { %v346_v0 = vadd.f32 %v345_v50, %v342_v56  ;;  %v397_v5 = vadd.f32 %v396_v58, %v393_v62 }
  0x7a   : > { %v373_v3 = vadd.f32 %v372_v53, %v369_v60 }
  0x7b   : > { %v350_v7 = vadd.f32 %v349_v57, %v346_v0  ;;  %v401_v10 = vadd.f32 %v400_v63, %v397_v5 }
  0x7c   : > { %v377_v9 = vadd.f32 %v376_v61, %v373_v3 }
  0x7d   : > { %v354_v12 = vadd.f32 %v353_v1, %v350_v7  ;;  %v405_v15 = vadd.f32 %v404_v6, %v401_v10 }
  0x7e   : > { %v381_v14 = vadd.f32 %v380_v4, %v377_v9 }
  0x7f   : > { %v357_v16 = vadd.f32 %v356_v8, %v354_v12  ;;  %v409_v19 = vadd.f32 %v408_v11, %v405_v15 }
  0x80   : > { %v384_v18 = vadd.f32 %v383_v13, %v381_v14 }
  0x81   : > { %358 = vst [vmem:[%s204_s14] sm:$0x3] %v357_v16  ;;  %v412_v20 = vadd.f32 %v411_v17, %v409_v19 }
  0x82   : > { %578 = vst [vmem:[%s204_s14 + $0x2] sm:$0x3] %v384_v18 }
  0x83   : > { %586 = vst [vmem:[%s204_s14 + $0x4] sm:$0x3] %v412_v20 }
  0x84   : > { %722 = shalt.err (!%p719_p9)
}
  0x85   : > { %s723_s4 = scalar_lea.hbm %s1096_s16, 96  ;;  %s727_s6 = scalar_lea.hbm %s1148_s3, 192 }
  0x86   : > { %p724_p10 = scmp.ne.s32.totalorder %s1096_s16, %s723_s4  ;;  %p728_p4 = scmp.lt.u32.totalorder %s1096_s16, %s1148_s3 }
  0x87   : > { %p729_p6 = scmp.lt.u32.totalorder %s727_s6, %s723_s4  ;;  %p731_p11 = scmp.lt.u32.totalorder %s723_s4, %s1096_s16 }
  0x88   : > { %p725_p13 = pnand %p724_p10, %p1162_p0 }
  0x89   : > { %p730_p12 = por %p729_p6, %p728_p4 }
  0x8a   : > { %p726_p1 = pneg %p725_p13 }
  0x8b   : > { %p732_p3 = por %p731_p11, %p730_p12 }
  0x8d   : > { %p733_p8 = pnand %p732_p3, %p726_p1 }
  0x8f   : > { %736 = shalt.err (!%p733_p8)
}
  0x90   : > { %s800_s29 = smov 32   ;;  %s801_s11 = smov 2  }
  0x91   : > { %596 = dma.vmem_to_hbm [thread:$0]  (%p1162_p0), %s1091_s15, 96, %s1096_s16, %s416_s18, %s800_s29, %s800_s29, %s801_s11  }
  0x92 PF: > { %s445_s12 = sand.u32 1, %s773_s22   ;;  %p1163_p2 = scmp.ne.s32.totalorder %s1157_s9, 0 }
  0x93   : > { %p1164_p5 = scmp.ge.s32.totalorder %s793_s27, 2  ;;  %s446_s14 = scalar_lea.sflag [#allocation6], %s445_s12 }
  0x95   : > { %p603_p7 = pnand %p1164_p5, %p1163_p2 }
  0x97   : > { %768 = dma.done.wait (!%p603_p7), %s446_s14, 96  }
  0x98   : > { %770 = vsyncadd (!%p603_p7), %s446_s14, 4294967200  ;;  %s23_s27 = sadd.s32 1, %s793_s27   ;;  %s1165_s7 = sld [smem:[#allocation11_spill]] }
  0x99   : > { %p20_p9 = scmp.ge.s32.totalorder %s23_s27, 4   ;;  %s1166_s22 = smov %s777_s23 }
  0x9a   : > { %s1167_s23 = smov %s781_s24  ;;  %s1168_s24 = smov %s890_s8 }
  0x9b   : > { %s1169_s25 = smov %s789_s26  ;;  %22 = sbr.rel (!%p20_p9) target bundleno = 18 (0x12), region = 80 }
  0x9e   : > { %s1170_s26 = smov %s1165_s7 }
  0xa2   :  { %451 = vsyncpa [#allocation5], 1 }
  0xa3   :  { %453 = vsyncpa [#allocation5 + $0x1], 1 }
  0xa4   :  { %454 = vsyncpa [#allocation6], 1 }
  0xa5   :  { %456 = vsyncpa [#allocation6 + $0x1], 1 }

</bundles_post_ra>
